<compile_context>
chip_gen: v7x
topology: tpu7x:2x2x1
jax: 0.10.0
libtpu: 0.0.40
codegen_flags: <defaults>
</compile_context>

<pallas_src>
import functools

import jax
import jax.numpy as jnp
from jax.experimental import pallas as pl
from jax.experimental.pallas import tpu as pltpu

EPS = 1e-5
_MIB = 1024 * 1024


def _round_up(x, m):
    return (x + m - 1) // m * m


def _vmem_budgets():
    """Generation-aware (vmem_limit_bytes, per-step pipeline-tile budget)."""
    try:
        cap = getattr(pltpu.get_tpu_info(), "vmem_capacity_bytes", None)
    except Exception:  # query unavailable -> conservative (v7x-like) defaults
        cap = None
    if cap is None or cap <= 64 * _MIB:
        # v7x-class: 64 MiB VMEM per TensorCore -> stay conservative.
        return 48 * _MIB, 16 * _MIB
    # v5e / v6e: 128 MiB VMEM -> bigger tiles amortize ~0.35us per-step cost.
    return 96 * _MIB, 48 * _MIB


def _choose_tiles(n, hw, bytes_per_lane_per_batch, tile_budget):
    """Pick (batch_tile, lane_tile, padded_hw).

    * lane tile is a multiple of 128 that divides round_up(hw, 128): no
      re-rounding of hw up to a lane-tile multiple (kills wasted DMA lanes).
    * prefers grids with >= 2 steps so both v7x TensorCores get work.
    * among those, maximizes per-step bytes under the VMEM tile budget.
    """
    hw_pad = _round_up(hw, 128)
    lane_divs = [d for d in range(128, hw_pad + 1, 128) if hw_pad % d == 0]
    n_divs = [d for d in range(1, n + 1) if n % d == 0]
    best_key, best = None, (1, 128)
    for tile_hw in lane_divs:
        for tn in n_divs:
            step_bytes = tn * tile_hw * bytes_per_lane_per_batch
            if step_bytes > tile_budget:
                continue
            grid_steps = (n // tn) * (hw_pad // tile_hw)
            key = (grid_steps >= 2, step_bytes, -grid_steps)
            if best_key is None or key > best_key:
                best_key, best = key, (tn, tile_hw)
    tn, tile_hw = best
    return tn, tile_hw, hw_pad


# ----------------------------------------------------------------------------
# Pallas kernels
# ----------------------------------------------------------------------------
def _layernorm_channels_kernel(x_ref, g_ref, b_ref, o_ref):
    """x_ref/o_ref: (TN, C, T); g_ref/b_ref: (1, C, 1).  f32 accumulation."""
    x = x_ref[...].astype(jnp.float32)
    mean = jnp.mean(x, axis=1, keepdims=True)            # (TN, 1, T)
    xc = x - mean
    var = jnp.mean(xc * xc, axis=1, keepdims=True)       # two-pass: no cancellation
    inv = jax.lax.rsqrt(var + EPS)                       # (TN, 1, T)
    # ((x - mean) * inv) * gamma + beta: broadcasts stay (TN,1,T) / (1,C,1)
    o_ref[...] = (xc * inv * g_ref[...].astype(jnp.float32)
                  + b_ref[...].astype(jnp.float32)).astype(o_ref.dtype)


def _gated_residual_layernorm_kernel(x_ref, co_ref, g_ref, b_ref, o_ref):
    """Fused GatedConv epilogue + LayerNormChannels.

    x_ref : (TN, C, T)   residual input of the GatedConv block
    co_ref: (TN, 2C, T)  output of the block's final 1x1 conv (val | gate)
    """
    c = x_ref.shape[1]
    co = co_ref[...].astype(jnp.float32)
    gate = co[:, c:, :]
    # sigmoid; pl.reciprocal(..., approx=True) would move the divide onto the
    # EUP slot, exact kept here to preserve tight f32 tolerances.
    sig = pl.reciprocal(1.0 + jnp.exp(-gate), approx=False)
    h = x_ref[...].astype(jnp.float32) + co[:, :c, :] * sig
    mean = jnp.mean(h, axis=1, keepdims=True)
    hc = h - mean
    var = jnp.mean(hc * hc, axis=1, keepdims=True)
    inv = jax.lax.rsqrt(var + EPS)
    o_ref[...] = (hc * inv * g_ref[...].astype(jnp.float32)
                  + b_ref[...].astype(jnp.float32)).astype(o_ref.dtype)


# ----------------------------------------------------------------------------
# Wrappers
# ----------------------------------------------------------------------------
def layer_norm_channels(x, gamma, beta):
    """LayerNormChannels: x (N,C,H,W), gamma/beta (1,C,1,1) -> (N,C,H,W)."""
    N, C, H, W = x.shape
    HW = H * W
    itemsize = jnp.dtype(x.dtype).itemsize
    vmem_limit, tile_budget = _vmem_budgets()
    # pipeline rows (x + out, double-buffered) + in-kernel f32 temporaries
    bytes_per_lane = 2 * C * itemsize * 2 + 3 * C * 4
    tn, tile_hw, hw_pad = _choose_tiles(N, HW, bytes_per_lane, tile_budget)

    x3 = x.reshape(N, C, HW)
    if hw_pad != HW:
        # TODO(synk): ragged HW could use masked partial lane tiles instead of
        # this pad/slice copy; 128-aligned H*W (16x16, 32x32, ...) is copy-free.
        x3 = jnp.pad(x3, ((0, 0), (0, 0), (0, hw_pad - HW)))
    g = gamma.reshape(1, C, 1)
    b = beta.reshape(1, C, 1)

    out = pl.pallas_call(
        _layernorm_channels_kernel,
        out_shape=jax.ShapeDtypeStruct((N, C, hw_pad), x.dtype),
        grid_spec=pltpu.PrefetchScalarGridSpec(
            num_scalar_prefetch=0,
            grid=(N // tn, hw_pad // tile_hw),
            in_specs=[
                pl.BlockSpec((tn, C, tile_hw), lambda n, s: (n, 0, s)),
                # constant index maps: gamma/beta DMA'd once, kept resident
                pl.BlockSpec((1, C, 1), lambda n, s: (0, 0, 0)),
                pl.BlockSpec((1, C, 1), lambda n, s: (0, 0, 0)),
            ],
            out_specs=pl.BlockSpec((tn, C, tile_hw), lambda n, s: (n, 0, s)),
        ),
        compiler_params=pltpu.CompilerParams(
            dimension_semantics=("parallel", "parallel"),
            vmem_limit_bytes=vmem_limit,
        ),
    )(x3, g, b)

    if hw_pad != HW:
        out = out[:, :, :HW]
    return out.reshape(N, C, H, W)


def gated_residual_layer_norm(x, conv_out, gamma, beta):
    """Fused (x + val*sigmoid(gate)) + LayerNormChannels.

    x: (N,C,H,W), conv_out: (N,2C,H,W), gamma/beta: (1,C,1,1) -> (N,C,H,W).
    The residual input x is aliased to the output (dead after the call).
    """
    N, C, H, W = x.shape
    HW = H * W
    itemsize = jnp.dtype(x.dtype).itemsize
    vmem_limit, tile_budget = _vmem_budgets()
    # pipeline rows (x + conv_out(2C) + out, double-buffered) + f32 temporaries
    bytes_per_lane = 4 * C * itemsize * 2 + 6 * C * 4
    tn, tile_hw, hw_pad = _choose_tiles(N, HW, bytes_per_lane, tile_budget)

    x3 = x.reshape(N, C, HW)
    co3 = conv_out.reshape(N, 2 * C, HW)
    if hw_pad != HW:
        # TODO(synk): see layer_norm_channels -- masked ragged tiles instead.
        pad = ((0, 0), (0, 0), (0, hw_pad - HW))
        x3 = jnp.pad(x3, pad)
        co3 = jnp.pad(co3, pad)
    g = gamma.reshape(1, C, 1)
    b = beta.reshape(1, C, 1)

    out = pl.pallas_call(
        _gated_residual_layernorm_kernel,
        out_shape=jax.ShapeDtypeStruct((N, C, hw_pad), x.dtype),
        grid_spec=pltpu.PrefetchScalarGridSpec(
            num_scalar_prefetch=0,
            grid=(N // tn, hw_pad // tile_hw),
            in_specs=[
                pl.BlockSpec((tn, C, tile_hw), lambda n, s: (n, 0, s)),
                pl.BlockSpec((tn, 2 * C, tile_hw), lambda n, s: (n, 0, s)),
                pl.BlockSpec((1, C, 1), lambda n, s: (0, 0, 0)),
                pl.BlockSpec((1, C, 1), lambda n, s: (0, 0, 0)),
            ],
            out_specs=pl.BlockSpec((tn, C, tile_hw), lambda n, s: (n, 0, s)),
        ),
        input_output_aliases={0: 0},   # write result in place of the residual
        compiler_params=pltpu.CompilerParams(
            dimension_semantics=("parallel", "parallel"),
            vmem_limit_bytes=vmem_limit,
        ),
    )(x3, co3, g, b)

    if hw_pad != HW:
        out = out[:, :, :HW]
    return out.reshape(N, C, H, W)


# ----------------------------------------------------------------------------
# GatedConvNet forward (convs via XLA, elementwise+LN epilogues via Pallas)
# ----------------------------------------------------------------------------
def _conv2d(x, w, b, padding):
    out = jax.lax.conv_general_dilated(
        x, w, window_strides=(1, 1),
        padding=((padding, padding), (padding, padding)),
        dimension_numbers=("NCHW", "OIHW", "NCHW"))
    return out + b.reshape(1, -1, 1, 1)


def _concat_elu(x):
    return jnp.concatenate([jax.nn.elu(x), jax.nn.elu(-x)], axis=1)


def _layer_norm_channels_ref(x, gamma, beta):
    mean = jnp.mean(x, axis=1, keepdims=True)
    var = jnp.mean((x - mean) ** 2, axis=1, keepdims=True)
    return (x - mean) / jnp.sqrt(var + EPS) * gamma + beta


def init_gated_conv_net_params(key, c_in, c_hidden=32, c_out=-1, num_layers=3):
    c_out = c_out if c_out > 0 else 2 * c_in
    keys = jax.random.split(key, 1 + 2 * num_layers)

    def conv_params(k, co, ci, ksize, scale=0.1):
        kw, kb = jax.random.split(k)
        w = scale * jax.random.normal(kw, (co, ci, ksize, ksize), jnp.float32)
        b = scale * jax.random.normal(kb, (co,), jnp.float32)
        return w, b

    params = {
        "conv_in": conv_params(keys[0], c_hidden, c_in, 3),
        "blocks": [],
        # final conv is zero-initialized, exactly as in the PyTorch module
        "conv_out": (jnp.zeros((c_out, 2 * c_hidden, 3, 3), jnp.float32),
                     jnp.zeros((c_out,), jnp.float32)),
    }
    for i in range(num_layers):
        params["blocks"].append({
            "conv1": conv_params(keys[1 + 2 * i], c_hidden, 2 * c_hidden, 3),
            "conv2": conv_params(keys[2 + 2 * i], 2 * c_hidden, 2 * c_hidden, 1),
            "gamma": jnp.ones((1, c_hidden, 1, 1), jnp.float32),
            "beta": jnp.zeros((1, c_hidden, 1, 1), jnp.float32),
        })
    return params


def gated_conv_net_forward(params, x, use_pallas=True):
    """Forward pass of GatedConvNet.  Returns (output, last hidden state)."""
    h = _conv2d(x, *params["conv_in"], padding=1)
    for blk in params["blocks"]:
        t = _concat_elu(h)
        t = _conv2d(t, *blk["conv1"], padding=1)
        t = _concat_elu(t)
        co = _conv2d(t, *blk["conv2"], padding=0)        # 1x1 conv -> (val | gate)
        if use_pallas:
            h = gated_residual_layer_norm(h, co, blk["gamma"], blk["beta"])
        else:
            val, gate = jnp.split(co, 2, axis=1)
            h = h + val * (1.0 / (1.0 + jnp.exp(-gate)))
            h = _layer_norm_channels_ref(h, blk["gamma"], blk["beta"])
    t = _concat_elu(h)
    out = _conv2d(t, *params["conv_out"], padding=1)     # zero-init -> zeros
    return out, h


if __name__ == "__main__":
    key = jax.random.PRNGKey(0)
    k_x, k_p, k_g, k_b, k_h, k_c = jax.random.split(key, 6)

    N, C_IN, H, W = 2, 4, 16, 16
    C_HIDDEN, NUM_LAYERS = 32, 3

    x = jax.random.normal(k_x, (N, C_IN, H, W), dtype=jnp.float32)
    params = init_gated_conv_net_params(k_p, C_IN, C_HIDDEN, -1, NUM_LAYERS)

    # 1) standalone LayerNormChannels kernel (non-trivial gamma/beta)
    gamma = 1.0 + 0.1 * jax.random.normal(k_g, (1, C_IN, 1, 1), jnp.float32)
    beta = 0.1 * jax.random.normal(k_b, (1, C_IN, 1, 1), jnp.float32)
    y = jax.block_until_ready(layer_norm_channels(x, gamma, beta))
    y_ref = _layer_norm_channels_ref(x, gamma, beta)
    assert y.shape == x.shape
    assert jnp.allclose(y, y_ref, atol=1e-4, rtol=1e-4), "LayerNormChannels mismatch"

    # 2) full GatedConvNet forward (jitted): Pallas fused gate+residual+LN vs ref
    fwd_pallas = jax.jit(functools.partial(gated_conv_net_forward, use_pallas=True))
    fwd_ref = jax.jit(functools.partial(gated_conv_net_forward, use_pallas=False))
    out, hid = jax.block_until_ready(fwd_pallas(params, x))
    out_ref, hid_ref = jax.block_until_ready(fwd_ref(params, x))
    assert out.shape == (N, 2 * C_IN, H, W)
    # final conv is zero-initialized (as in the PyTorch module), so also check
    # the hidden state feeding it to make the comparison non-trivial
    assert jnp.allclose(hid, hid_ref, atol=1e-4, rtol=1e-4), "hidden state mismatch"
    assert jnp.allclose(out, out_ref, atol=1e-4, rtol=1e-4), "network output mismatch"

    # 3) bf16 activation path of the fused kernel (halves HBM traffic; the
    #    kernel still accumulates in f32 after load)
    gh = 1.0 + 0.1 * jax.random.normal(k_g, (1, C_HIDDEN, 1, 1), jnp.float32)
    bh = 0.1 * jax.random.normal(k_b, (1, C_HIDDEN, 1, 1), jnp.float32)
    h32 = jax.random.normal(k_h, (N, C_HIDDEN, H, W), jnp.float32)
    co32 = jax.random.normal(k_c, (N, 2 * C_HIDDEN, H, W), jnp.float32)
    h16, co16 = h32.astype(jnp.bfloat16), co32.astype(jnp.bfloat16)
    y16 = jax.block_until_ready(gated_residual_layer_norm(h16, co16, gh, bh))
    assert y16.dtype == jnp.bfloat16
    hh, cc = h16.astype(jnp.float32), co16.astype(jnp.float32)
    val, gate = jnp.split(cc, 2, axis=1)
    ref16 = _layer_norm_channels_ref(hh + val * (1.0 / (1.0 + jnp.exp(-gate))), gh, bh)
    assert jnp.allclose(y16.astype(jnp.float32), ref16, atol=3e-2, rtol=3e-2), \
        "bf16 fused kernel mismatch"

    print("KERNEL_OK")
</pallas_src>

<mosaic_0001>
module attributes {stable_mosaic.version = 11 : i64} {
  func.func @_layernorm_channels_kernel(%arg0: i32, %arg1: i32, %arg2: memref<2x4x128xf32, #tpu.memory_space<vmem>>, %arg3: memref<1x4x1xf32, #tpu.memory_space<vmem>>, %arg4: memref<1x4x1xf32, #tpu.memory_space<vmem>>, %arg5: memref<2x4x128xf32, #tpu.memory_space<vmem>>) attributes {dimension_semantics = [#tpu.dimension_semantics<parallel>, #tpu.dimension_semantics<parallel>], iteration_bounds = array<i64: 1, 2>, scalar_prefetch = 0 : i64, scratch_operands = 0 : i64, tpu.core_type = #tpu.core_type<tc>, window_params = [{transform_indices = @transform_0, window_bounds = array<i64: 2, 4, 128>}, {pipeline_mode = #tpu.pipeline_mode<synchronous>, transform_indices = @transform_1, window_bounds = array<i64: 1, 4, 1>}, {pipeline_mode = #tpu.pipeline_mode<synchronous>, transform_indices = @transform_2, window_bounds = array<i64: 1, 4, 1>}, {transform_indices = @transform_3, window_bounds = array<i64: 2, 4, 128>}]} {
    %c0 = arith.constant 0 : index
    %c0_0 = arith.constant 0 : index
    %c0_1 = arith.constant 0 : index
    %0 = vector.load %arg2[%c0, %c0_0, %c0_1] : memref<2x4x128xf32, #tpu.memory_space<vmem>>, vector<2x4x128xf32>
    %cst = arith.constant dense<0.000000e+00> : vector<2x128xf32>
    %1 = vector.multi_reduction <add>, %0, %cst [1] : vector<2x4x128xf32> to vector<2x128xf32>
    %2 = vector.shape_cast %1 : vector<2x128xf32> to vector<2x1x128xf32>
    %cst_2 = arith.constant 4.000000e+00 : f32
    %3 = vector.broadcast %cst_2 : f32 to vector<2x1x128xf32>
    %4 = arith.divf %2, %3 : vector<2x1x128xf32>
    %5 = vector.broadcast %4 : vector<2x1x128xf32> to vector<2x4x128xf32>
    %6 = arith.subf %0, %5 : vector<2x4x128xf32>
    %7 = arith.mulf %6, %6 : vector<2x4x128xf32>
    %cst_3 = arith.constant dense<0.000000e+00> : vector<2x128xf32>
    %8 = vector.multi_reduction <add>, %7, %cst_3 [1] : vector<2x4x128xf32> to vector<2x128xf32>
    %9 = vector.shape_cast %8 : vector<2x128xf32> to vector<2x1x128xf32>
    %cst_4 = arith.constant 4.000000e+00 : f32
    %10 = vector.broadcast %cst_4 : f32 to vector<2x1x128xf32>
    %11 = arith.divf %9, %10 : vector<2x1x128xf32>
    %cst_5 = arith.constant 9.99999974E-6 : f32
    %12 = vector.broadcast %cst_5 : f32 to vector<2x1x128xf32>
    %13 = arith.addf %11, %12 : vector<2x1x128xf32>
    %14 = math.rsqrt %13 : vector<2x1x128xf32>
    %15 = vector.broadcast %14 : vector<2x1x128xf32> to vector<2x4x128xf32>
    %16 = arith.mulf %6, %15 : vector<2x4x128xf32>
    %c0_6 = arith.constant 0 : index
    %c0_7 = arith.constant 0 : index
    %c0_8 = arith.constant 0 : index
    %17 = vector.load %arg3[%c0_6, %c0_7, %c0_8] : memref<1x4x1xf32, #tpu.memory_space<vmem>>, vector<1x4x1xf32>
    %18 = vector.broadcast %17 : vector<1x4x1xf32> to vector<2x4x128xf32>
    %19 = arith.mulf %16, %18 : vector<2x4x128xf32>
    %c0_9 = arith.constant 0 : index
    %c0_10 = arith.constant 0 : index
    %c0_11 = arith.constant 0 : index
    %20 = vector.load %arg4[%c0_9, %c0_10, %c0_11] : memref<1x4x1xf32, #tpu.memory_space<vmem>>, vector<1x4x1xf32>
    %21 = vector.broadcast %20 : vector<1x4x1xf32> to vector<2x4x128xf32>
    %22 = arith.addf %19, %21 : vector<2x4x128xf32>
    %c0_12 = arith.constant 0 : index
    %c0_13 = arith.constant 0 : index
    %c0_14 = arith.constant 0 : index
    %23 = vector.load %arg5[%c0_12, %c0_13, %c0_14] : memref<2x4x128xf32, #tpu.memory_space<vmem>>, vector<2x4x128xf32>
    tpu.vector_store %arg5[%c0_12, %c0_13, %c0_14], %22 {strides = array<i32>} : memref<2x4x128xf32, #tpu.memory_space<vmem>>, vector<2x4x128xf32>,
    return
  }
  func.func @transform_0(%arg0: i32, %arg1: i32) -> (i32, i32, i32) {
    %c0_i32 = arith.constant 0 : i32
    %c0_i32_0 = arith.constant 0 : i32
    return %arg0, %c0_i32, %arg1 : i32, i32, i32
  }
  func.func @transform_1(%arg0: i32, %arg1: i32) -> (i32, i32, i32) {
    %c0_i32 = arith.constant 0 : i32
    %c0_i32_0 = arith.constant 0 : i32
    %c0_i32_1 = arith.constant 0 : i32
    %c0_i32_2 = arith.constant 0 : i32
    return %c0_i32, %c0_i32_0, %c0_i32_1 : i32, i32, i32
  }
  func.func @transform_2(%arg0: i32, %arg1: i32) -> (i32, i32, i32) {
    %c0_i32 = arith.constant 0 : i32
    %c0_i32_0 = arith.constant 0 : i32
    %c0_i32_1 = arith.constant 0 : i32
    %c0_i32_2 = arith.constant 0 : i32
    return %c0_i32, %c0_i32_0, %c0_i32_1 : i32, i32, i32
  }
  func.func @transform_3(%arg0: i32, %arg1: i32) -> (i32, i32, i32) {
    %c0_i32 = arith.constant 0 : i32
    %c0_i32_0 = arith.constant 0 : i32
    return %arg0, %c0_i32, %arg1 : i32, i32, i32
  }
}

</mosaic_0001>

<bundles_post_ra>
// kernel: tpu_custom_call.1
= control target key start
LH: loop header
LB: loop body
LE: loop exit
PB: predicated region body
PF: predicated region fallthrough
CT: control target
= control target key end

     0   :  { %8 = vsyncpa [#allocation3], 0  ;;  %s791_s0 = inlined_call_operand.hbm [shape: f32[2,4,256], index: 0, kind: input, shape index: {}]   ;;  %s792_s1 = inlined_call_operand.vmem [shape: f32[1,4,1], index: 1, kind: input, shape index: {}]   ;;  %s793_s2 = inlined_call_operand.vmem [shape: f32[1,4,1], index: 2, kind: input, shape index: {}]   ;;  %s794_s3 = inlined_call_operand.hbm [shape: f32[2,4,256], index: 3, kind: output, shape index: {}]  }
   0x1   :  { %10 = vsyncpa [#allocation3 + $0x1], 0 }
   0x2   :  { %11 = vsyncpa [#allocation4], 0 }
   0x3   :  { %13 = vsyncpa [#allocation4 + $0x1], 0  ;;  %s604_s12 = smov 0   ;;  %s606_s13 = smov 0  }
   0x4   :  { %s608_s14 = smov 0   ;;  %s610_s15 = smov 0  }
   0x5   :  { %s612_s16 = smov 0   ;;  %s614_s17 = smov 0  }
   0x6 LB: > { %s374_s18 = sadd.s32 4294967295, %s573_s17   ;;  %s375_s19 = sadd.s32 4294967294, %s573_s17   ;;  %s573_s17 = sphi %s614_s17, %s19_s17   ;;  %s569_s16 = sphi %s612_s16, %s808_s16   ;;  %s565_s15 = sphi %s610_s15, %s807_s15   ;;  %s561_s14 = sphi %s608_s14, %s806_s14   ;;  %s557_s13 = sphi %s606_s13, %s805_s13   ;;  %s553_s12 = sphi %s604_s12, %s804_s12  }
   0x7   : > { %s28_s20 = sadd.s32 1, %s569_s16  ;;  %s40_s21 = sadd.s32 1, %s561_s14 }
   0x8   : > { %p29_p0 = scmp.ge.s32.totalorder %s28_s20, 2  ;;  %p47_p1 = scmp.ne.s32.totalorder %s561_s14, %s557_s13 }
   0x9   : > { %p48_p2 = scmp.eq.s32.totalorder %s573_s17, 0  ;;  %p53_p3 = scmp.ne.s32.totalorder %s557_s13, %s553_s12 }
   0xa   : > { %s810_s20 = smov (%p29_p0, %s28_s20), 0  ;;  %p54_p5 = scmp.eq.s32.totalorder %s374_s18, 0 }
   0xb   : > { %p645_p4 = por %p48_p2, %p47_p1  ;;  %s36_s23 = ssub.s32 %s569_s16, %s810_s20 }
   0xc   : > { %p121_p6 = scmp.eq.s32.totalorder %s374_s18, 1  ;;  %p38_p7 = scmp.eq.s32.totalorder %s36_s23, 0 }
   0xd   : > { %p651_p8 = por %p54_p5, %p53_p3  ;;  %p127_p10 = scmp.eq.s32.totalorder %s375_s19, 1 }
   0xe   : > { %p655_p9 = por %p121_p6, %p47_p1  ;;  %p399_p13 = scmp.lt.s32.totalorder %s573_s17, 2 }
   0xf   : > { %s660_s26 = scalar_select %p38_p7, %s561_s14, %s40_s21  }
  0x10   : > { %s798_s25 = scalar_select %p655_p9, 1, 0 }
  0x11   : > { %p662_p11 = por %p127_p10, %p53_p3  ;;  %s153_s28 = sand.u32 1, %s561_s14  }
  0x12   : > { %s378_s29 = sshll.u32 %s153_s28, 3  ;;  %s379_s30 = sshll.u32 %s569_s16, 6 }
  0x13   : > { %s799_s27 = scalar_select %p662_p11, 1, 0 }
  0x14   : > { %s673_s6 = scalar_lea.hbm %s791_s0, %s379_s30  ;;  %s157_s7 = scalar_lea.vmem [#allocation2], %s378_s29 }
  0x15   : > { %s166_s8 = sshll.u32 %s157_s7, 4  ;;  %p679_p0 = pnand %p399_p13, %p645_p4  ;;  %s675_s8 = int_to_ptr.vmem [resolvable:$true] %s166_s8 }
  0x16   : > { %s683_s10 = scalar_lea.sflag [#allocation3], %s153_s28  ;;  %s461_s11 = scalar_lea.hbm %s673_s6, 128 }
  0x17   : > { %p462_p1 = scmp.ne.s32.totalorder %s673_s6, %s461_s11  ;;  %p463_p2 = pneg %p679_p0 }
  0x18   : > { %s466_s21 = scalar_lea.hbm %s791_s0, 256  ;;  %p467_p4 = scmp.lt.u32.totalorder %s673_s6, %s791_s0 }
  0x19   : > { %p464_p3 = pnand %p463_p2, %p462_p1  ;;  %p468_p6 = scmp.lt.u32.totalorder %s466_s21, %s461_s11 }
  0x1a   : > { %p470_p10 = scmp.lt.u32.totalorder %s461_s11, %s673_s6 }
  0x1b   : > { %p465_p5 = pneg %p464_p3  ;;  %p469_p7 = por %p468_p6, %p467_p4 }
  0x1d   : > { %p471_p13 = por %p470_p10, %p469_p7 }
  0x1f   : > { %p472_p12 = pnand %p471_p13, %p465_p5 }
  0x21   : > { %475 = shalt.err (!%p472_p12)
}
  0x22   : > { %s476_s28 = scalar_lea.vmem %s675_s8, 128  ;;  %s575_s29 = smov [#allocation2]  }
  0x23   : > { %p477_p1 = scmp.ne.s32.totalorder %s675_s8, %s476_s28  ;;  %s481_s30 = sshll.u32 %s575_s29, 4  ;;  %s482_s30 = int_to_ptr.vmem [resolvable:$false] %s481_s30 }
  0x24   : > { %s483_s4 = scalar_lea.vmem %s482_s30, 256  ;;  %p484_p9 = scmp.lt.s32.totalorder %s675_s8, %s482_s30 }
  0x25   : > { %p479_p3 = pnand %p477_p1, %p463_p2  ;;  %p485_p4 = scmp.lt.s32.totalorder %s483_s4, %s476_s28 }
  0x27   : > { %p480_p11 = pneg %p479_p3  ;;  %p486_p6 = por %p485_p4, %p484_p9 }
  0x29   : > { %p487_p7 = pnand %p486_p6, %p480_p11 }
  0x2b   : > { %490 = shalt.err (!%p487_p7)
}
  0x2c   : > { %s576_s5 = smov 128   ;;  %s577_s7 = smov 64  }
  0x2d   : > { %s578_s11 = smov 4   ;;  %p380_p12 = scmp.ge.s32.totalorder %s573_s17, 1 }
  0x2e   : > { %394 = dma.hbm_to_vmem [thread:$0]  (!%p679_p0), %s673_s6, 128, %s675_s8, %s683_s10, %s576_s5, %s577_s7, %s578_s11  }
  0x2f   : > { %p174_p2 = scmp.lt.s32.totalorder %s573_s17, 3 }
  0x31   : > { %p175_p5 = pnand %p380_p12, %p174_p2 }
  0x32   : > { %s714_s18 = sand.u32 (!%p175_p5), 1, %s557_s13  }
  0x33   : > { %178 = sbr.rel (%p175_p5) target bundleno = 211 (0xd3), region = 32  ;;  %s381_s19 = sshll.u32 (!%p175_p5), %s714_s18, 3 }
  0x34   : > { %s181_s21 = scalar_lea.sflag (!%p175_p5), [#allocation3], %s714_s18  ;;  %s184_s22 = scalar_lea.vmem (!%p175_p5), [#allocation2], %s381_s19 }
  0x3a   : > { %544 = dma.done.wait (%p651_p8), %s181_s21, 128  }
  0x3b   : > { %546 = vsyncadd (%p651_p8), %s181_s21, 4294967168  ;;  %v579_v0 = vmov 0   ;;  %v255_v1 = vld [vmem:[%s792_s1] sm:$0xf]  ;;  %vm211_vm0 = vcmask 1043456   ;;  %s206_s24 = scalar_lea.vmem [#allocation5], %s381_s19 }
  0x3c   : > { %456 = vset.pattern.permute.xlu0 %v579_v0  ;;  %v263_v2 = vld [vmem:[%s793_s2] sm:$0xf]  ;;  %v210_v4 = vld [vmem:[%s184_s22 + $0x4] sm:$0xf]  ;;  %s289_s23 = sshll.u32 %s206_s24, 4  ;;  %s384_s28 = sshll.u32 %s565_s15, 6  ;;  %s737_s23 = int_to_ptr.vmem [resolvable:$true] %s289_s23 }
  0x3d   : > { %258 = vperm.xlu0 %456, %v255_v1   ;;  %v209_v3 = vld [vmem:[%s184_s22] sm:$0xf]  ;;  %v219_v6 = vsel %vm211_vm0, %v210_v4, 0.0  ;;  %s742_s4 = scalar_lea.hbm %s794_s3, %s384_s28  ;;  %s274_s5 = scalar_lea.sflag [#allocation4], %s714_s18 }
  0x3e   : > { %v212_v5 = vsel %vm211_vm0, %v209_v3, 0.0  ;;  %v220_v8 = vrot.slane %v219_v6, 4  ;;  %s491_s7 = scalar_lea.vmem %s737_s23, 128  ;;  %p801_p9 = scmp.ne.s32.totalorder %s798_s25, 0 }
  0x3f   : > { %v213_v7 = vrot.slane %v212_v5, 4  ;;  %p492_p8 = scmp.ne.s32.totalorder %s737_s23, %s491_s7  ;;  %s580_s15 = smov [#allocation5]  }
  0x40   : > { %v221_v10 = vadd.f32 %v220_v8, %v219_v6  ;;  %s495_s11 = sshll.u32 %s580_s15, 4  ;;  %s496_s11 = int_to_ptr.vmem [resolvable:$false] %s495_s11 }
  0x41   : > { %266 = vperm.xlu0 %456, %v263_v2   ;;  %v214_v9 = vadd.f32 %v213_v7, %v212_v5  ;;  %p493_p11 = pnand %p492_p8, %p801_p9  ;;  %s497_s19 = scalar_lea.vmem %s496_s11, 256 }
  0x42   : > { %v222_v12 = vrot.slane %v221_v10, 2  ;;  %p498_p10 = scmp.lt.s32.totalorder %s737_s23, %s496_s11  ;;  %p499_p13 = scmp.lt.s32.totalorder %s497_s19, %s491_s7 }
  0x43   : > { %v215_v11 = vrot.slane %v214_v9, 2  ;;  %p494_p0 = pneg %p493_p11 }
  0x44   : > { %v223_v14 = vadd.f32 %v222_v12, %v221_v10  ;;  %p500_p1 = por %p499_p13, %p498_p10 }
  0x45   : > { %v216_v13 = vadd.f32 %v215_v11, %v214_v9 }
  0x46   : > { %v224_v16 = vrot.slane %v223_v14, 1  ;;  %p501_p3 = pnand %p500_p1, %p494_p0 }
  0x47   : > { %v217_v15 = vrot.slane %v216_v13, 1 }
  0x48   : > { %v225_v18 = vadd.f32 %v224_v16, %v223_v14 }
  0x49   : > { %v218_v17 = vadd.f32 %v217_v15, %v216_v13 }
  0x4a   : > { %v228_v20 = vmul.f32 0.25, %v225_v18 }
  0x4b   : > { %v227_v19 = vmul.f32 0.25, %v218_v17 }
  0x4c   : > { %v230_v22 = vsub.f32 %v210_v4, %v228_v20 }
  0x4d   : > { %v229_v21 = vsub.f32 %v209_v3, %v227_v19 }
  0x4e   : > { %v232_v24 = vmul.f32 %v230_v22, %v230_v22 }
  0x4f   : > { %v231_v23 = vmul.f32 %v229_v21, %v229_v21 }
  0x50   : > { %v240_v26 = vsel %vm211_vm0, %v232_v24, 0.0 }
  0x51   : > { %v233_v25 = vsel %vm211_vm0, %v231_v23, 0.0  ;;  %v241_v28 = vrot.slane %v240_v26, 4 }
  0x52   : > { %v234_v27 = vrot.slane %v233_v25, 4 }
  0x53   : > { %v242_v30 = vadd.f32 %v241_v28, %v240_v26 }
  0x54   : > { %v235_v29 = vadd.f32 %v234_v27, %v233_v25 }
  0x55   : > { %v243_v32 = vrot.slane %v242_v30, 2 }
  0x56   : > { %v236_v31 = vrot.slane %v235_v29, 2 }
  0x57   : > { %v244_v34 = vadd.f32 %v243_v32, %v242_v30 }
  0x58   : > { %v237_v33 = vadd.f32 %v236_v31, %v235_v29 }
  0x59   : > { %v245_v36 = vrot.slane %v244_v34, 1 }
  0x5a   : > { %v238_v35 = vrot.slane %v237_v33, 1 }
  0x5b   : > { %v246_v38 = vadd.f32 %v245_v36, %v244_v34 }
  0x5c   : > { %v239_v37 = vadd.f32 %v238_v35, %v237_v33 }
  0x5d   : > { %v248_v40 = vmul.f32 0.25, %v246_v38 }
  0x5e   : > { %v247_v39 = vmul.f32 0.25, %v239_v37 }
  0x5f   : > { %v250_v42 = vadd.f32 1e-05, %v248_v40 }
  0x60   : > { %v249_v41 = vadd.f32 1e-05, %v247_v39 }
  0x62   : > { %457 = vrsqrt.f32 %v249_v41 }
  0x63   : > { %459 = vrsqrt.f32 %v250_v42 }
  0x6c   : > { %v458_v43 = vpop.eup %457 }
  0x6d   : > { %v460_v44 = vpop.eup %459  ;;  %v253_v45 = vmul.f32 %v458_v43, %v229_v21 }
  0x6e   : > { %v254_v46 = vmul.f32 %v460_v44, %v230_v22 }
  0xbc   : > { %v259_v47 = vpop.permute.xlu0 %258 }
  0xbd   : > { %v261_v48 = vmul.f32 %v259_v47, %v253_v45  ;;  %v262_v49 = vmul.f32 %v259_v47, %v254_v46 }
  0xc0   : > { %v267_v50 = vpop.permute.xlu0 %266 }
  0xc1   : > { %v269_v51 = vadd.f32 %v267_v50, %v261_v48  ;;  %v270_v52 = vadd.f32 %v267_v50, %v262_v49 }
  0xc3   : > { %271 = vst [vmem:[%s206_s24] sm:$0xf] %v269_v51  ;;  %272 = vst [vmem:[%s206_s24 + $0x4] sm:$0xf] %v270_v52 }
  0xc4   : > { %504 = shalt.err (!%p501_p3)
}
  0xc5   : > { %s505_s21 = scalar_lea.hbm %s742_s4, 128  ;;  %s509_s8 = scalar_lea.hbm %s794_s3, 256 }
  0xc6   : > { %p506_p4 = scmp.ne.s32.totalorder %s742_s4, %s505_s21  ;;  %p510_p12 = scmp.lt.u32.totalorder %s742_s4, %s794_s3 }
  0xc7   : > { %p511_p2 = scmp.lt.u32.totalorder %s509_s8, %s505_s21  ;;  %p513_p8 = scmp.lt.u32.totalorder %s505_s21, %s742_s4 }
  0xc8   : > { %p507_p6 = pnand %p506_p4, %p801_p9 }
  0xc9   : > { %p512_p5 = por %p511_p2, %p510_p12 }
  0xca   : > { %p508_p7 = pneg %p507_p6 }
  0xcb   : > { %p514_p11 = por %p513_p8, %p512_p5 }
  0xcd   : > { %p515_p0 = pnand %p514_p11, %p508_p7 }
  0xcf   : > { %518 = shalt.err (!%p515_p0)
}
  0xd0   : > { %s581_s24 = smov 64   ;;  %s582_s28 = smov 128  }
  0xd1   : > { %s583_s29 = smov 4  }
  0xd2   : > { %389 = dma.vmem_to_hbm [thread:$0]  (%p801_p9), %s737_s23, 128, %s742_s4, %s274_s5, %s581_s24, %s582_s28, %s583_s29  }
  0xd3 PF: > { %s304_s30 = sand.u32 1, %s553_s12   ;;  %p802_p10 = scmp.ne.s32.totalorder %s799_s27, 0 }
  0xd4   : > { %p803_p13 = scmp.ge.s32.totalorder %s573_s17, 2  ;;  %s305_s7 = scalar_lea.sflag [#allocation4], %s304_s30 }
  0xd6   : > { %p396_p1 = pnand %p803_p13, %p802_p10 }
  0xd8   : > { %548 = dma.done.wait (!%p396_p1), %s305_s7, 128  }
  0xd9   : > { %550 = vsyncadd (!%p396_p1), %s305_s7, 4294967168  ;;  %s19_s17 = sadd.s32 1, %s573_s17   ;;  %s804_s12 = smov %s557_s13 }
  0xda   : > { %p16_p3 = scmp.ge.s32.totalorder %s19_s17, 4   ;;  %s805_s13 = smov %s561_s14 }
  0xdb   : > { %s806_s14 = smov %s660_s26  ;;  %s807_s15 = smov %s569_s16 }
  0xdc   : > { %s808_s16 = smov %s810_s20  ;;  %18 = sbr.rel (!%p16_p3) target bundleno = 6 (0x6), region = 77 }
  0xe3   :  { %310 = vsyncpa [#allocation3], 1 }
  0xe4   :  { %312 = vsyncpa [#allocation3 + $0x1], 1 }
  0xe5   :  { %313 = vsyncpa [#allocation4], 1 }
  0xe6   :  { %315 = vsyncpa [#allocation4 + $0x1], 1 }

</bundles_post_ra>
